<compile_context>
chip_gen: v6e
topology: v6e:2x2x1
jax: 0.10.0
libtpu: 0.0.40
codegen_flags: <defaults>
</compile_context>

<pallas_src>
import jax
import jax.numpy as jnp
from jax.experimental import pallas as pl
from jax.experimental.pallas import tpu as pltpu


def _net4_kernel(x_ref, wt_ref, b_ref, o_ref):
    x = x_ref[...]                         # (TB, 128) f32 (streamed tile)
    wt = wt_ref[...]                       # (128, 10) f32 (VMEM-resident)
    b = b_ref[...]                         # (1, 10)   f32 (VMEM-resident)

    # Linear: logits = x @ W^T + b   (MXU, f32 accumulate)
    logits = jnp.dot(x, wt, preferred_element_type=jnp.float32) + b

    # Numerically stable log_softmax over the class axis.
    m = jnp.max(logits, axis=-1, keepdims=True)        # XLU reduce (only one left)
    shifted = logits - m
    # exp-sum on the (otherwise idle) MXU instead of a lane-sparse XLU reduce:
    ones = jnp.ones((logits.shape[-1], 1), jnp.float32)
    sum_exp = jnp.dot(jnp.exp(shifted), ones,
                      preferred_element_type=jnp.float32)   # (TB, 1)
    o_ref[...] = shifted - jnp.log(sum_exp)


def net4_forward(x, wt, b2, *, max_tile=4096):
    """x: (B, 128) f32; wt: (128, 10) f32 (pre-transposed); b2: (1, 10) f32.

    max_tile is generation-tunable (e.g. ~8192 on v7x where HBM is faster and
    the fixed per-step overhead dominates even harder).
    """
    B, IN = x.shape
    OUT = wt.shape[1]
    LANE = 128

    # Batch tile: multiple of 8 (sublane), capped at max_tile rows.
    TB = min(max_tile, ((B + 7) // 8) * 8)
    TB = max(8, TB)

    grid = (pl.cdiv(B, TB),)

    # VMEM budget: double-buffered x tile + double-buffered lane-padded out tile
    # + resident (lane-padded) weight/bias.
    vmem_bytes = (
        2 * TB * IN * 4            # x blocks
        + 2 * TB * LANE * 4        # out blocks (OUT=10 lane-pads to 128 in VMEM)
        + IN * LANE * 4            # weight (lane-padded)
        + 8 * LANE * 4             # bias (sublane/lane-padded)
    )
    vmem_limit = min(100 * 1024 * 1024,
                     max(32 * 1024 * 1024, int(vmem_bytes * 3 // 2)))

    cost = pl.CostEstimate(
        flops=2 * B * IN * OUT + 2 * B * OUT,          # matmul + MXU exp-sum
        transcendentals=B * (OUT + 1),                 # exp + log
        bytes_accessed=B * IN * 4 + IN * OUT * 4 + OUT * 4 + B * OUT * 4,
    )

    return pl.pallas_call(
        _net4_kernel,
        out_shape=jax.ShapeDtypeStruct((B, OUT), jnp.float32),
        grid=grid,
        in_specs=[
            pl.BlockSpec((TB, IN), lambda i: (i, 0)),     # x: streamed over batch
            pl.BlockSpec((IN, OUT), lambda i: (0, 0)),    # weight: resident
            pl.BlockSpec((1, OUT), lambda i: (0, 0)),     # bias: resident
        ],
        out_specs=pl.BlockSpec((TB, OUT), lambda i: (i, 0)),
        compiler_params=pltpu.CompilerParams(
            dimension_semantics=("parallel",),            # megacore-shardable
            vmem_limit_bytes=vmem_limit,
        ),
        cost_estimate=cost,
    )(x, wt, b2)


if __name__ == "__main__":
    key = jax.random.PRNGKey(0)
    k_x, k_w, k_b = jax.random.split(key, 3)

    B, IN, OUT = 8, 128, 10
    # Deterministic param init mimicking nn.Linear default:
    # U(-1/sqrt(fan_in), 1/sqrt(fan_in))
    bound = 1.0 / jnp.sqrt(jnp.float32(IN))
    weight = jax.random.uniform(k_w, (OUT, IN), jnp.float32, -bound, bound)  # PyTorch layout
    bias = jax.random.uniform(k_b, (OUT,), jnp.float32, -bound, bound)

    # Hoisted, one-time parameter prep (not per forward call).
    wt = jnp.asarray(weight.T)             # (128, 10)
    b2 = jnp.asarray(bias.reshape(1, -1))  # (1, 10)

    x = jax.random.normal(k_x, (B, IN), jnp.float32)

    fwd = jax.jit(net4_forward)
    out = fwd(x, wt, b2)
    jax.block_until_ready(out)

    # Reference check in plain JAX
    ref_logits = x @ weight.T + bias
    ref = jax.nn.log_softmax(ref_logits, axis=1)
    assert out.shape == (B, OUT)
    assert jnp.allclose(out, ref, atol=1e-5, rtol=1e-5), "mismatch vs reference"

    # Also exercise a ragged batch (not a multiple of the tile) to validate the
    # cdiv/ragged-grid path end-to-end.
    B2 = 37
    x2 = jax.random.normal(jax.random.PRNGKey(1), (B2, IN), jnp.float32)
    out2 = jax.block_until_ready(fwd(x2, wt, b2))
    ref2 = jax.nn.log_softmax(x2 @ weight.T + bias, axis=1)
    assert out2.shape == (B2, OUT)
    assert jnp.allclose(out2, ref2, atol=1e-5, rtol=1e-5), "ragged-batch mismatch"

    print("KERNEL_OK")
</pallas_src>

<mosaic_0001>
module attributes {stable_mosaic.version = 11 : i64} {
  func.func @_net4_kernel(%arg0: i32, %arg1: memref<8x128xf32, #tpu.memory_space<vmem>>, %arg2: memref<128x10xf32, #tpu.memory_space<vmem>>, %arg3: memref<1x10xf32, #tpu.memory_space<vmem>>, %arg4: memref<8x10xf32, #tpu.memory_space<vmem>>) attributes {dimension_semantics = [#tpu.dimension_semantics<parallel>], iteration_bounds = array<i64: 1>, scalar_prefetch = 0 : i64, scratch_operands = 0 : i64, tpu.core_type = #tpu.core_type<tc>, window_params = [{transform_indices = @transform_0, window_bounds = array<i64: 8, 128>}, {pipeline_mode = #tpu.pipeline_mode<synchronous>, transform_indices = @transform_1, window_bounds = array<i64: 128, 10>}, {pipeline_mode = #tpu.pipeline_mode<synchronous>, transform_indices = @transform_2, window_bounds = array<i64: 1, 10>}, {transform_indices = @transform_3, window_bounds = array<i64: 8, 10>}]} {
    %c0 = arith.constant 0 : index
    %c0_0 = arith.constant 0 : index
    %0 = vector.load %arg1[%c0, %c0_0] : memref<8x128xf32, #tpu.memory_space<vmem>>, vector<8x128xf32>
    %c0_1 = arith.constant 0 : index
    %c0_2 = arith.constant 0 : index
    %1 = vector.load %arg2[%c0_1, %c0_2] : memref<128x10xf32, #tpu.memory_space<vmem>>, vector<128x10xf32>
    %c0_3 = arith.constant 0 : index
    %c0_4 = arith.constant 0 : index
    %2 = vector.load %arg3[%c0_3, %c0_4] : memref<1x10xf32, #tpu.memory_space<vmem>>, vector<1x10xf32>
    %cst = arith.constant dense<0.000000e+00> : vector<8x10xf32>
    %3 = tpu.matmul %0, %1, %cst {dimension_numbers = #tpu.dot_dimension_numbers<[1], [0], [0], [1], [0, 0, 1, 1], [], []>} : vector<8x128xf32>, vector<128x10xf32>, vector<8x10xf32> -> vector<8x10xf32>
    %4 = vector.broadcast %2 : vector<1x10xf32> to vector<8x10xf32>
    %5 = arith.addf %3, %4 : vector<8x10xf32>
    %cst_5 = arith.constant dense<0xFF800000> : vector<8xf32>
    %6 = vector.multi_reduction <maximumf>, %5, %cst_5 [1] : vector<8x10xf32> to vector<8xf32>
    %7 = vector.shape_cast %6 : vector<8xf32> to vector<8x1xf32>
    %8 = vector.broadcast %7 : vector<8x1xf32> to vector<8x10xf32>
    %9 = arith.subf %5, %8 : vector<8x10xf32>
    %cst_6 = arith.constant 1.000000e+00 : f32
    %10 = vector.broadcast %cst_6 : f32 to vector<10x1xf32>
    %11 = math.exp %9 : vector<8x10xf32>
    %cst_7 = arith.constant dense<0.000000e+00> : vector<8x1xf32>
    %12 = tpu.matmul %11, %10, %cst_7 {dimension_numbers = #tpu.dot_dimension_numbers<[1], [0], [0], [1], [0, 0, 1, 1], [], []>} : vector<8x10xf32>, vector<10x1xf32>, vector<8x1xf32> -> vector<8x1xf32>
    %13 = math.log %12 : vector<8x1xf32>
    %14 = vector.broadcast %13 : vector<8x1xf32> to vector<8x10xf32>
    %15 = arith.subf %9, %14 : vector<8x10xf32>
    %c0_8 = arith.constant 0 : index
    %c0_9 = arith.constant 0 : index
    %16 = vector.load %arg4[%c0_8, %c0_9] : memref<8x10xf32, #tpu.memory_space<vmem>>, vector<8x10xf32>
    tpu.vector_store %arg4[%c0_8, %c0_9], %15 {strides = array<i32>} : memref<8x10xf32, #tpu.memory_space<vmem>>, vector<8x10xf32>,
    return
  }
  func.func @transform_0(%arg0: i32) -> (i32, i32) {
    %c0_i32 = arith.constant 0 : i32
    %c0_i32_0 = arith.constant 0 : i32
    return %arg0, %c0_i32 : i32, i32
  }
  func.func @transform_1(%arg0: i32) -> (i32, i32) {
    %c0_i32 = arith.constant 0 : i32
    %c0_i32_0 = arith.constant 0 : i32
    %c0_i32_1 = arith.constant 0 : i32
    return %c0_i32, %c0_i32_0 : i32, i32
  }
  func.func @transform_2(%arg0: i32) -> (i32, i32) {
    %c0_i32 = arith.constant 0 : i32
    %c0_i32_0 = arith.constant 0 : i32
    %c0_i32_1 = arith.constant 0 : i32
    return %c0_i32, %c0_i32_0 : i32, i32
  }
  func.func @transform_3(%arg0: i32) -> (i32, i32) {
    %c0_i32 = arith.constant 0 : i32
    %c0_i32_0 = arith.constant 0 : i32
    return %arg0, %c0_i32 : i32, i32
  }
}

</mosaic_0001>

<bundles_post_ra>
// kernel: net4_forward.1
= control target key start
LH: loop header
LB: loop body
LE: loop exit
PB: predicated region body
PF: predicated region fallthrough
CT: control target
= control target key end

     0   :  { %v313_v1 = vmov 0.0   ;;  %vm314_vm0 = vmmov 0   ;;  %s418_s0 = inlined_call_operand.vmem [shape: f32[8,128], index: 0, kind: input, shape index: {}]   ;;  %s419_s1 = inlined_call_operand.vmem [shape: f32[128,10], index: 1, kind: input, shape index: {}]   ;;  %s420_s2 = inlined_call_operand.vmem [shape: f32[1,10], index: 2, kind: input, shape index: {}]   ;;  %s421_s3 = inlined_call_operand.hbm [shape: f32[8,10], index: 3, kind: output, shape index: {}]  }
   0x1   :  { %v31_v0 = vld [vmem:[%s419_s1 + $0x78] sm:$0xff]  ;;  %239 = vmatprep.subr.mxu0 %v313_v1  ;;  %v30_v2 = vld [vmem:[%s419_s1 + $0x70] sm:$0xff]  ;;  %271 = vmatprep.mubr.msk.f32.mxu0 %vm314_vm0, %v313_v1  ;;  %v29_v3 = vld [vmem:[%s419_s1 + $0x68] sm:$0xff] }
   0x2   :  { %240 = vmatpush3.msra.mxu0 %v31_v0  ;;  %274 = vmatprep.subr.mxu1 %v313_v1  ;;  %v28_v4 = vld [vmem:[%s419_s1 + $0x60] sm:$0xff] }
   0x3   :  { %241 = vmatprep.subr.mxu0 %v313_v1  ;;  %278 = vmatprep.mubr.msk.f32.mxu1 %vm314_vm0, %v313_v1 }
   0x4   :  { %242 = vmatpush3.msra.mxu0 %v30_v2 }
   0x5   :  { %243 = vmatprep.subr.mxu0 %v313_v1 }
   0x6   :  { %244 = vmatpush3.msra.mxu0 %v29_v3 }
   0x7   :  { %8 = vsyncpa [#allocation3], 0  ;;  %245 = vmatprep.subr.mxu0 %v313_v1  ;;  %v27_v5 = vld [vmem:[%s419_s1 + $0x58] sm:$0xff]  ;;  %v26_v6 = vld [vmem:[%s419_s1 + $0x50] sm:$0xff]  ;;  %vm109_vm1 = vcmask 80896   ;;  %vm119_vm2 = vcmask 1041408  }
   0x8   :  { %246 = vmatpush3.msra.mxu0 %v28_v4  ;;  %v25_v7 = vld [vmem:[%s419_s1 + $0x48] sm:$0xff]  ;;  %v24_v8 = vld [vmem:[%s419_s1 + $0x40] sm:$0xff]  ;;  %v23_v9 = vld [vmem:[%s419_s1 + $0x38] sm:$0xff]  ;;  %v315_v23 = vmov 1.0   ;;  %v316_v28 = vmov 0  }
   0x9   :  { %247 = vmatprep.subr.mxu0 %v313_v1  ;;  %v22_v10 = vld [vmem:[%s419_s1 + $0x30] sm:$0xff]  ;;  %v21_v11 = vld [vmem:[%s419_s1 + $0x28] sm:$0xff]  ;;  %v20_v12 = vld [vmem:[%s419_s1 + $0x20] sm:$0xff]  ;;  %275 = vmatpush3.msk.msra.mxu1 %vm119_vm2, %v315_v23 }
   0xa   :  { %248 = vmatpush3.msra.mxu0 %v27_v5  ;;  %v19_v13 = vld [vmem:[%s419_s1 + $0x18] sm:$0xff]  ;;  %v18_v14 = vld [vmem:[%s419_s1 + $0x10] sm:$0xff]  ;;  %v17_v15 = vld [vmem:[%s419_s1 + $0x8] sm:$0xff]  ;;  %276 = vmatprep.subr.mxu1 %v313_v1 }
   0xb   :  { %249 = vmatprep.subr.mxu0 %v313_v1  ;;  %v16_v16 = vld [vmem:[%s419_s1] sm:$0xff]  ;;  %277 = vmatpush3.msra.mxu1 %v315_v23 }
   0xc   :  { %250 = vmatpush3.msra.mxu0 %v26_v6  ;;  %v15_v17 = vld [vmem:[%s418_s0] sm:$0xff]  ;;  %286 = vset.pattern.permute.xlu0 %v316_v28  ;;  %s317_s0 = smov [#allocation2]  }
   0xd   :  { %251 = vmatprep.subr.mxu0 %v313_v1  ;;  %v216_v18 = vld [vmem:[%s420_s2] ss:$0 sm:$0xff]  ;;  %s208_s1 = sshll.u32 %s317_s0, 4  ;;  %s209_s1 = int_to_ptr.vmem [resolvable:$true] %s208_s1 }
   0xe   :  { %252 = vmatpush3.msra.mxu0 %v25_v7  ;;  %s291_s2 = scalar_lea.vmem %s209_s1, 128  ;;  %p296_p1 = scmp.lt.s32.totalorder %s209_s1, %s209_s1 }
   0xf   :  { %253 = vmatprep.subr.mxu0 %v313_v1  ;;  %p292_p0 = scmp.ne.s32.totalorder %s209_s1, %s291_s2  ;;  %p297_p2 = scmp.lt.s32.totalorder %s291_s2, %s291_s2 }
  0x10   :  { %254 = vmatpush3.msra.mxu0 %v24_v8 }
  0x11   :  { %255 = vmatprep.subr.mxu0 %v313_v1  ;;  %p298_p3 = por %p297_p2, %p296_p1 }
  0x12   :  { %256 = vmatpush3.msra.mxu0 %v23_v9 }
  0x13   :  { %257 = vmatprep.subr.mxu0 %v313_v1  ;;  %p299_p4 = pnand %p298_p3, %p292_p0 }
  0x14   :  { %258 = vmatpush3.msra.mxu0 %v22_v10 }
  0x15   :  { %259 = vmatprep.subr.mxu0 %v313_v1 }
  0x16   :  { %260 = vmatpush3.msra.mxu0 %v21_v11 }
  0x17   :  { %261 = vmatprep.subr.mxu0 %v313_v1 }
  0x18   :  { %262 = vmatpush3.msra.mxu0 %v20_v12 }
  0x19   :  { %263 = vmatprep.subr.mxu0 %v313_v1 }
  0x1a   :  { %264 = vmatpush3.msra.mxu0 %v19_v13 }
  0x1b   :  { %265 = vmatprep.subr.mxu0 %v313_v1 }
  0x1c   :  { %266 = vmatpush3.msra.mxu0 %v18_v14 }
  0x1d   :  { %267 = vmatprep.subr.mxu0 %v313_v1 }
  0x1e   :  { %268 = vmatpush3.msra.mxu0 %v17_v15 }
  0x1f   :  { %269 = vmatprep.subr.mxu0 %v313_v1 }
  0x20   :  { %270 = vmatpush3.msra.mxu0 %v16_v16 }
  0x21   :  { %272 = vmatmul.mubr.f32.vlgmr.msra.gmra.mxu0 %v15_v17 }
  0xe1   :  { %v105_v19 = vpop.f32.mrf.mxu0 }
  0xe2   :  { %v106_v20 = vadd.f32 %v216_v18, %v105_v19 }
  0xe3   :  { %v273_v21 = vpop.f32.mrf.mxu0 }
  0xe4   :  { %v110_v22 = vsel %vm109_vm1, %v106_v20, -inf }
  0xe5   :  { %111 = vmax.xlane.f32.xlu0 %v110_v22 }
 0x16e   :  { %v112_v24 = vpop.xlane.xlu0 %111 }
 0x16f   :  { %v113_v25 = vsub.f32 %v106_v20, %v112_v24 }
 0x171   :  { %v114_v26 = vmul.f32 1.442695, %v113_v25 }
 0x173   :  { %287 = vpow2.f32 %v114_v26 }
 0x180   :  { %v288_v27 = vpop.eup %287 }
 0x181   :  { %279 = vmatmul.mubr.msk.f32.vlgmr.msra.gmra.mxu1 %vm109_vm1, %v288_v27 }
 0x241   :  { %v189_v29 = vpop.f32.mrf.mxu1 }
 0x242   :  { %289 = vlog2.f32 %v189_v29 }
 0x243   :  { %v280_v30 = vpop.f32.mrf.mxu1 }
 0x24f   :  { %v290_v31 = vpop.eup %289 }
 0x250   :  { %v194_v32 = vmul.f32 0.6931472, %v290_v31 }
 0x252   :  { %197 = vperm.xlu0 %286, %v194_v32  }
 0x2cd   :  { %v198_v33 = vpop.permute.xlu0 %197 }
 0x2ce   :  { %v200_v34 = vsub.f32 %v113_v25, %v198_v33 }
 0x2d0   :  { %201 = vst.msk [vmem:[#allocation2] sm:$0xff] %vm109_vm1, %v200_v34 }
 0x2d1   :  { %302 = shalt.err (!%p299_p4)
}
 0x2d2   :  { %211 = dma.vmem_to_hbm [thread:$0]  %s209_s1, 128, %s421_s3, [#allocation3]  }
 0x2d3   :  { %311 = dma.done.wait [#allocation3], 128  }
 0x2d4   :  { %312 = vsyncadd [#allocation3], 4294967168 }
 0x2d5   :  { %215 = vsyncpa [#allocation3], 1 }

</bundles_post_ra>
